<compile_context>
chip_gen: v6e
topology: v6e:2x2x1
jax: 0.10.0
libtpu: 0.0.40
codegen_flags: <defaults>
</compile_context>

<pallas_src>
import functools

import numpy as np
import jax
import jax.numpy as jnp
from jax.experimental import pallas as pl
from jax.experimental.pallas import tpu as pltpu

EDGE_TYPES = 2


# ----------------------------------------------------------------------------
# Kernel
# ----------------------------------------------------------------------------
def _nriconv_kernel(x_ref, snd_ref, rcv_ref, gate_ref, recT_ref,
                    w1s_ref, w1r_ref, b1_ref, w2_ref, b2_ref,
                    wo1x_ref, wo1a_ref, bo1_ref, wo2_ref, bo2_ref,
                    out_ref, *, out_ch, compute_dtype):
    O = out_ch
    x_f32 = x_ref[0]                                    # [TB*N, F] f32 (residual)
    x = x_f32.astype(compute_dtype)                     # matmul operand

    senders = snd_ref[0]                                # [TB*E, F] compute dtype
    receivers = rcv_ref[0]                              # (host one-hot gather)

    # msg_fc1 for BOTH edge types at once, concat-free (weights pre-split).
    h1 = (jnp.dot(senders, w1s_ref[...], preferred_element_type=jnp.float32)
          + jnp.dot(receivers, w1r_ref[...], preferred_element_type=jnp.float32))
    h1 = jnp.maximum(h1 + b1_ref[...], 0.0)             # [TB*E, ET*O]

    # msg_fc2 fused across edge types via block-diagonal W2 (dropout p=0).
    h2 = jnp.dot(h1.astype(compute_dtype), w2_ref[...],
                 preferred_element_type=jnp.float32)
    h2 = jnp.maximum(h2 + b2_ref[...], 0.0)             # [TB*E, ET*O]

    # Lane-dense edge-type gating (gate already expanded to ET*O on host,
    # with type-0 columns zeroed when skip_first is requested).
    gated = h2 * gate_ref[0]
    msgs = gated[:, :O]
    for i in range(1, EDGE_TYPES):
        msgs = msgs + gated[:, i * O:(i + 1) * O]       # [TB*E, O] f32

    # Aggregate messages to nodes (pre-transposed block-diagonal rel_rec^T).
    agg = jnp.dot(recT_ref[...], msgs.astype(compute_dtype),
                  preferred_element_type=jnp.float32)   # [TB*N, O]

    # Output MLP, concat-free via split out_fc1 weights.
    p = (jnp.dot(x, wo1x_ref[...], preferred_element_type=jnp.float32)
         + jnp.dot(agg.astype(compute_dtype), wo1a_ref[...],
                   preferred_element_type=jnp.float32))
    p = jnp.maximum(p + bo1_ref[...], 0.0)              # relu(out_fc1)
    p = jnp.dot(p.astype(compute_dtype), wo2_ref[...],
                preferred_element_type=jnp.float32)
    p = jnp.maximum(p + bo2_ref[...], 0.0)              # relu(out_fc2)

    out_ref[0] = (x_f32 + p).astype(out_ref.dtype)      # residual


# ----------------------------------------------------------------------------
# Host-side sizing heuristics
# ----------------------------------------------------------------------------
def _pad8_128_bytes(rows, cols, itemsize):
    """(8,128)-padded VMEM bytes for a 2-D tile."""
    return (-(-rows // 8) * 8) * (-(-cols // 128) * 128) * itemsize


def _vmem_footprint_bytes(tb, n_nodes, n_edges, feat, out_ch, cd_size):
    ET = EDGE_TYPES
    rows_n, rows_e = tb * n_nodes, tb * n_edges
    fp = 0
    # grid-varying blocks (double-buffered by the Pallas pipeline)
    fp += 2 * _pad8_128_bytes(rows_n, feat, 4)                  # x (f32)
    fp += 2 * 2 * _pad8_128_bytes(rows_e, feat, cd_size)        # senders+receivers
    fp += 2 * _pad8_128_bytes(rows_e, ET * out_ch, 4)           # expanded gate
    fp += 2 * _pad8_128_bytes(rows_n, feat, 4)                  # output (f32)
    # grid-invariant blocks (double-buffered by default too)
    fp += 2 * _pad8_128_bytes(rows_n, rows_e, cd_size)          # rel_rec^T blockdiag
    fp += 2 * (2 * _pad8_128_bytes(feat, ET * out_ch, cd_size)
               + _pad8_128_bytes(ET * out_ch, ET * out_ch, cd_size)
               + _pad8_128_bytes(feat, out_ch, cd_size)
               + 2 * _pad8_128_bytes(out_ch, out_ch, cd_size)
               + 2 * _pad8_128_bytes(1, ET * out_ch, 4)
               + 2 * _pad8_128_bytes(1, out_ch, 4))
    # in-kernel intermediates (h1/h2/gated, agg, p) — rough upper bound
    fp += 3 * _pad8_128_bytes(rows_e, ET * out_ch, 4)
    fp += 3 * _pad8_128_bytes(rows_n, out_ch, 4)
    return fp


def _min_parallel_steps():
    """Require >=2 'parallel' grid steps only on dual-TensorCore chips (v7x);
    on single-TC v5e/v6e extra steps are purely sequential overhead."""
    try:
        kind = jax.devices()[0].device_kind.lower()
    except Exception:
        return 1
    return 2 if ("v7" in kind or "7x" in kind) else 1


def _choose_batch_block(batch, n_nodes, n_edges, feat, out_ch, cd_size,
                        vmem_budget_bytes, min_grid):
    """Largest TB dividing the batch whose VMEM footprint fits the budget and
    that keeps at least `min_grid` grid steps (when the batch allows it)."""
    best = 1
    for tb in range(1, batch + 1):
        if batch % tb:
            continue
        if (batch // tb) < min_grid and batch >= min_grid:
            continue
        if _vmem_footprint_bytes(tb, n_nodes, n_edges, feat, out_ch,
                                 cd_size) > vmem_budget_bytes:
            continue
        best = tb
    return best


# ----------------------------------------------------------------------------
# Forward wrapper
# ----------------------------------------------------------------------------
def nriconv_forward(inputs, rel_type, rel_rec, rel_send, params,
                    skip_first=False, batch_block=None,
                    compute_dtype=jnp.bfloat16,
                    vmem_budget_bytes=24 * 1024 * 1024):
    B, N, F = inputs.shape
    E = rel_rec.shape[0]
    O = params["w2"].shape[-1]
    ET = EDGE_TYPES
    assert F == O, "residual add requires in_channels == out_channels"

    cd_size = np.dtype(compute_dtype).itemsize
    if batch_block is not None:
        TB = batch_block
    else:
        TB = _choose_batch_block(B, N, E, F, O, cd_size, vmem_budget_bytes,
                                 _min_parallel_steps())
    assert B % TB == 0, "batch_block must divide batch size"
    G = B // TB

    # ----- host-side prep (one-hot gathers, fused / split weights) ----------
    x_f32 = inputs.astype(jnp.float32)
    rel_rec_f = rel_rec.astype(jnp.float32)
    rel_send_f = rel_send.astype(jnp.float32)

    # One-hot row gather hoisted to the host.
    senders = jnp.einsum("en,bnf->bef", rel_send_f, x_f32)
    receivers = jnp.einsum("en,bnf->bef", rel_rec_f, x_f32)
    senders = senders.astype(compute_dtype).reshape(G, TB * E, F)
    receivers = receivers.astype(compute_dtype).reshape(G, TB * E, F)

    # Pre-transposed block-diagonal aggregation incidence kron(I_TB, rel_rec)^T.
    recT_bd = jnp.kron(jnp.eye(TB, dtype=jnp.float32),
                       rel_rec_f.T).astype(compute_dtype)       # [TB*N, TB*E]

    # msg_fc1 weights stacked across edge types, split into sender/receiver halves.
    w1 = params["w1"].astype(jnp.float32)                       # [ET, 2F, O]
    w1_stacked = jnp.transpose(w1, (1, 0, 2)).reshape(2 * F, ET * O)
    w1_send = w1_stacked[:F].astype(compute_dtype)              # [F, ET*O]
    w1_recv = w1_stacked[F:].astype(compute_dtype)
    b1_stacked = params["b1"].reshape(1, ET * O).astype(jnp.float32)

    # msg_fc2 fused across edge types via a block-diagonal weight.
    w2 = params["w2"].astype(jnp.float32)                       # [ET, O, O]
    w2_bd = jax.scipy.linalg.block_diag(*[w2[i] for i in range(ET)])
    w2_bd = w2_bd.astype(compute_dtype)                         # [ET*O, ET*O]
    b2_stacked = params["b2"].reshape(1, ET * O).astype(jnp.float32)

    wo1 = params["wo1"].astype(jnp.float32)                     # [F+O, O]
    wo1_x = wo1[:F].astype(compute_dtype)
    wo1_agg = wo1[F:].astype(compute_dtype)
    bo1 = params["bo1"].astype(jnp.float32)
    wo2 = params["wo2"].astype(compute_dtype)
    bo2 = params["bo2"].astype(jnp.float32)

    # Lane-dense edge-type gate: each gate value repeated O times along lanes.
    # skip_first -> zero the type-0 gate columns (exactly drops that edge type).
    gate = jnp.repeat(rel_type.astype(jnp.float32), O, axis=-1)  # [B, E, ET*O]
    if skip_first:
        gate = gate.at[..., :O].set(0.0)
    gate = gate.reshape(G, TB * E, ET * O)

    x_flat = x_f32.reshape(G, TB * N, F)

    # ----- cost estimate hint for the XLA scheduler --------------------------
    rows_e, rows_n = TB * E, TB * N
    flops_step = 2 * (
        2 * rows_e * F * (ET * O)          # msg_fc1 (sender + receiver halves)
        + rows_e * (ET * O) * (ET * O)     # fused msg_fc2
        + rows_n * rows_e * O              # aggregation
        + rows_n * (F * O + O * O)         # out_fc1 (x + agg halves)
        + rows_n * O * O)                  # out_fc2
    bytes_accessed = int(
        x_flat.size * 4 * 2                # x in + out
        + senders.size * cd_size * 2       # senders + receivers
        + gate.size * 4
        + recT_bd.size * cd_size
        + (w1_send.size + w1_recv.size + w2_bd.size
           + wo1_x.size + wo1_agg.size + wo2.size) * cd_size
        + (b1_stacked.size + b2_stacked.size + bo1.size + bo2.size) * 4)
    cost = pl.CostEstimate(flops=int(G * flops_step), transcendentals=0,
                           bytes_accessed=bytes_accessed)

    kernel = functools.partial(_nriconv_kernel, out_ch=O,
                               compute_dtype=compute_dtype)

    grid_spec = pltpu.PrefetchScalarGridSpec(
        num_scalar_prefetch=0,
        grid=(G,),
        in_specs=[
            pl.BlockSpec((1, TB * N, F), lambda g: (g, 0, 0)),        # x
            pl.BlockSpec((1, TB * E, F), lambda g: (g, 0, 0)),        # senders
            pl.BlockSpec((1, TB * E, F), lambda g: (g, 0, 0)),        # receivers
            pl.BlockSpec((1, TB * E, ET * O), lambda g: (g, 0, 0)),   # gate
            pl.BlockSpec((TB * N, TB * E), lambda g: (0, 0)),         # rel_rec^T bd
            pl.BlockSpec((F, ET * O), lambda g: (0, 0)),              # w1 send half
            pl.BlockSpec((F, ET * O), lambda g: (0, 0)),              # w1 recv half
            pl.BlockSpec((1, ET * O), lambda g: (0, 0)),              # b1
            pl.BlockSpec((ET * O, ET * O), lambda g: (0, 0)),         # w2 block-diag
            pl.BlockSpec((1, ET * O), lambda g: (0, 0)),              # b2
            pl.BlockSpec((F, O), lambda g: (0, 0)),                   # wo1 x half
            pl.BlockSpec((O, O), lambda g: (0, 0)),                   # wo1 agg half
            pl.BlockSpec((1, O), lambda g: (0, 0)),                   # bo1
            pl.BlockSpec((O, O), lambda g: (0, 0)),                   # wo2
            pl.BlockSpec((1, O), lambda g: (0, 0)),                   # bo2
        ],
        out_specs=pl.BlockSpec((1, TB * N, F), lambda g: (g, 0, 0)),
    )

    footprint = _vmem_footprint_bytes(TB, N, E, F, O, cd_size)
    vmem_limit = int(min(64 * 1024 * 1024,
                         max(32 * 1024 * 1024, 2 * footprint)))

    out_flat = pl.pallas_call(
        kernel,
        out_shape=jax.ShapeDtypeStruct((G, TB * N, F), inputs.dtype),
        grid_spec=grid_spec,
        compiler_params=pltpu.CompilerParams(
            dimension_semantics=("parallel",),
            vmem_limit_bytes=vmem_limit),
        cost_estimate=cost,
    )(x_flat, senders, receivers, gate, recT_bd,
      w1_send, w1_recv, b1_stacked, w2_bd, b2_stacked,
      wo1_x, wo1_agg, bo1, wo2, bo2)

    return out_flat.reshape(B, N, F)


# ----------------------------------------------------------------------------
# Pure-JAX reference + synthetic data helpers
# ----------------------------------------------------------------------------
def nriconv_reference(inputs, rel_type, rel_rec, rel_send, params,
                      skip_first=False):
    """Pure-JAX f32 reference matching the PyTorch forward (eval / dropout=0)."""
    receivers = jnp.einsum("en,bnf->bef", rel_rec, inputs)
    senders = jnp.einsum("en,bnf->bef", rel_send, inputs)
    pre_msg = jnp.concatenate([senders, receivers], axis=-1)
    O = params["w2"].shape[-1]
    all_msgs = jnp.zeros(pre_msg.shape[:2] + (O,), jnp.float32)
    start_idx = 1 if skip_first else 0
    for i in range(start_idx, EDGE_TYPES):
        h = jax.nn.relu(pre_msg @ params["w1"][i] + params["b1"][i])
        h = jax.nn.relu(h @ params["w2"][i] + params["b2"][i])
        all_msgs = all_msgs + h * rel_type[:, :, i:i + 1]
    agg = jnp.einsum("beo,en->bno", all_msgs, rel_rec)
    aug = jnp.concatenate([inputs, agg], axis=-1)
    p = jax.nn.relu(aug @ params["wo1"] + params["bo1"])
    p = jax.nn.relu(p @ params["wo2"] + params["bo2"])
    return inputs + p


def make_params(key, in_channels, out_channels):
    """Deterministic synthetic parameters (weights stored as [in, out])."""
    ks = jax.random.split(key, 8)

    def lin(k, fan_in, fan_out):
        bound = 1.0 / jnp.sqrt(fan_in)
        kw, kb = jax.random.split(k)
        w = jax.random.uniform(kw, (fan_in, fan_out), jnp.float32, -bound, bound)
        b = jax.random.uniform(kb, (1, fan_out), jnp.float32, -bound, bound)
        return w, b

    w1s, b1s, w2s, b2s = [], [], [], []
    for i in range(EDGE_TYPES):
        w, b = lin(ks[i], 2 * in_channels, out_channels)
        w1s.append(w); b1s.append(b)
        w, b = lin(ks[2 + i], out_channels, out_channels)
        w2s.append(w); b2s.append(b)
    wo1, bo1 = lin(ks[4], in_channels + out_channels, out_channels)
    wo2, bo2 = lin(ks[5], out_channels, out_channels)
    return {
        "w1": jnp.stack(w1s), "b1": jnp.stack(b1s),
        "w2": jnp.stack(w2s), "b2": jnp.stack(b2s),
        "wo1": wo1, "bo1": bo1, "wo2": wo2, "bo2": bo2,
    }


def make_relations(n_ball):
    """Fully connected graph (no self loops), as in the NRI docstring."""
    pairs = [(r, s) for r in range(n_ball) for s in range(n_ball) if s != r]
    E = len(pairs)
    rel_rec = jnp.zeros((E, n_ball), jnp.float32)
    rel_send = jnp.zeros((E, n_ball), jnp.float32)
    for e, (r, s) in enumerate(pairs):
        rel_rec = rel_rec.at[e, r].set(1.0)
        rel_send = rel_send.at[e, s].set(1.0)
    return rel_rec, rel_send


if __name__ == "__main__":
    # Small shapes consistent with the module: residual add requires feat == out.
    B, N_BALL = 8, 5
    IN_CH = OUT_CH = 32

    key = jax.random.PRNGKey(0)
    k_x, k_rt, k_p = jax.random.split(key, 3)

    inputs = jax.random.normal(k_x, (B, N_BALL, IN_CH), jnp.float32)
    rel_rec, rel_send = make_relations(N_BALL)
    E = rel_rec.shape[0]
    rel_type = jax.nn.softmax(
        jax.random.normal(k_rt, (B, E, EDGE_TYPES), jnp.float32), axis=-1)
    params = make_params(k_p, IN_CH, OUT_CH)

    ref = nriconv_reference(inputs, rel_type, rel_rec, rel_send, params)

    # Exact-math path (f32 matmul operands): validates kernel logic tightly.
    out_f32 = jax.block_until_ready(
        nriconv_forward(inputs, rel_type, rel_rec, rel_send, params,
                        compute_dtype=jnp.float32))
    assert out_f32.shape == (B, N_BALL, IN_CH)
    assert jnp.allclose(out_f32, ref, atol=1e-4, rtol=1e-4), (
        f"f32 max abs err = {jnp.max(jnp.abs(out_f32 - ref))}")

    # skip_first path (gate column zeroing on host).
    ref_skip = nriconv_reference(inputs, rel_type, rel_rec, rel_send, params,
                                 skip_first=True)
    out_skip = jax.block_until_ready(
        nriconv_forward(inputs, rel_type, rel_rec, rel_send, params,
                        skip_first=True, compute_dtype=jnp.float32))
    assert jnp.allclose(out_skip, ref_skip, atol=1e-4, rtol=1e-4), (
        f"skip_first max abs err = {jnp.max(jnp.abs(out_skip - ref_skip))}")

    # Fast path (bf16 MXU operands, f32 accumulation): loose tolerance.
    out_bf16 = jax.block_until_ready(
        nriconv_forward(inputs, rel_type, rel_rec, rel_send, params))
    assert out_bf16.shape == (B, N_BALL, IN_CH)
    rel_err = (jnp.linalg.norm((out_bf16 - ref).astype(jnp.float32))
               / jnp.linalg.norm(ref.astype(jnp.float32)))
    assert rel_err < 2e-2, f"bf16 relative error = {rel_err}"

    print("KERNEL_OK")
</pallas_src>

<mosaic_0001>
module attributes {stable_mosaic.version = 11 : i64} {
  func.func @_nriconv_kernel(%arg0: i32, %arg1: memref<1x40x32xf32, #tpu.memory_space<vmem>>, %arg2: memref<1x160x32xf32, #tpu.memory_space<vmem>>, %arg3: memref<1x160x32xf32, #tpu.memory_space<vmem>>, %arg4: memref<1x160x64xf32, #tpu.memory_space<vmem>>, %arg5: memref<40x160xf32, #tpu.memory_space<vmem>>, %arg6: memref<32x64xf32, #tpu.memory_space<vmem>>, %arg7: memref<32x64xf32, #tpu.memory_space<vmem>>, %arg8: memref<1x64xf32, #tpu.memory_space<vmem>>, %arg9: memref<64x64xf32, #tpu.memory_space<vmem>>, %arg10: memref<1x64xf32, #tpu.memory_space<vmem>>, %arg11: memref<32x32xf32, #tpu.memory_space<vmem>>, %arg12: memref<32x32xf32, #tpu.memory_space<vmem>>, %arg13: memref<1x32xf32, #tpu.memory_space<vmem>>, %arg14: memref<32x32xf32, #tpu.memory_space<vmem>>, %arg15: memref<1x32xf32, #tpu.memory_space<vmem>>, %arg16: memref<1x40x32xf32, #tpu.memory_space<vmem>>) attributes {dimension_semantics = [#tpu.dimension_semantics<parallel>], iteration_bounds = array<i64: 1>, scalar_prefetch = 0 : i64, scratch_operands = 0 : i64, tpu.core_type = #tpu.core_type<tc>, window_params = [{transform_indices = @transform_0, window_bounds = array<i64: 1, 40, 32>}, {transform_indices = @transform_1, window_bounds = array<i64: 1, 160, 32>}, {transform_indices = @transform_2, window_bounds = array<i64: 1, 160, 32>}, {transform_indices = @transform_3, window_bounds = array<i64: 1, 160, 64>}, {pipeline_mode = #tpu.pipeline_mode<synchronous>, transform_indices = @transform_4, window_bounds = array<i64: 40, 160>}, {pipeline_mode = #tpu.pipeline_mode<synchronous>, transform_indices = @transform_5, window_bounds = array<i64: 32, 64>}, {pipeline_mode = #tpu.pipeline_mode<synchronous>, transform_indices = @transform_6, window_bounds = array<i64: 32, 64>}, {pipeline_mode = #tpu.pipeline_mode<synchronous>, transform_indices = @transform_7, window_bounds = array<i64: 1, 64>}, {pipeline_mode = #tpu.pipeline_mode<synchronous>, transform_indices = @transform_8, window_bounds = array<i64: 64, 64>}, {pipeline_mode = #tpu.pipeline_mode<synchronous>, transform_indices = @transform_9, window_bounds = array<i64: 1, 64>}, {pipeline_mode = #tpu.pipeline_mode<synchronous>, transform_indices = @transform_10, window_bounds = array<i64: 32, 32>}, {pipeline_mode = #tpu.pipeline_mode<synchronous>, transform_indices = @transform_11, window_bounds = array<i64: 32, 32>}, {pipeline_mode = #tpu.pipeline_mode<synchronous>, transform_indices = @transform_12, window_bounds = array<i64: 1, 32>}, {pipeline_mode = #tpu.pipeline_mode<synchronous>, transform_indices = @transform_13, window_bounds = array<i64: 32, 32>}, {pipeline_mode = #tpu.pipeline_mode<synchronous>, transform_indices = @transform_14, window_bounds = array<i64: 1, 32>}, {transform_indices = @transform_15, window_bounds = array<i64: 1, 40, 32>}]} {
    %c0 = arith.constant 0 : index
    %c0_0 = arith.constant 0 : index
    %c0_1 = arith.constant 0 : index
    %0 = vector.load %arg1[%c0, %c0_0, %c0_1] : memref<1x40x32xf32, #tpu.memory_space<vmem>>, vector<1x40x32xf32>
    %1 = vector.shape_cast %0 : vector<1x40x32xf32> to vector<40x32xf32>
    %c0_2 = arith.constant 0 : index
    %c0_3 = arith.constant 0 : index
    %c0_4 = arith.constant 0 : index
    %2 = vector.load %arg2[%c0_2, %c0_3, %c0_4] : memref<1x160x32xf32, #tpu.memory_space<vmem>>, vector<1x160x32xf32>
    %3 = vector.shape_cast %2 : vector<1x160x32xf32> to vector<160x32xf32>
    %c0_5 = arith.constant 0 : index
    %c0_6 = arith.constant 0 : index
    %c0_7 = arith.constant 0 : index
    %4 = vector.load %arg3[%c0_5, %c0_6, %c0_7] : memref<1x160x32xf32, #tpu.memory_space<vmem>>, vector<1x160x32xf32>
    %5 = vector.shape_cast %4 : vector<1x160x32xf32> to vector<160x32xf32>
    %c0_8 = arith.constant 0 : index
    %c0_9 = arith.constant 0 : index
    %6 = vector.load %arg6[%c0_8, %c0_9] : memref<32x64xf32, #tpu.memory_space<vmem>>, vector<32x64xf32>
    %cst = arith.constant dense<0.000000e+00> : vector<160x64xf32>
    %7 = tpu.matmul %3, %6, %cst {dimension_numbers = #tpu.dot_dimension_numbers<[1], [0], [0], [1], [0, 0, 1, 1], [], []>} : vector<160x32xf32>, vector<32x64xf32>, vector<160x64xf32> -> vector<160x64xf32>
    %c0_10 = arith.constant 0 : index
    %c0_11 = arith.constant 0 : index
    %8 = vector.load %arg7[%c0_10, %c0_11] : memref<32x64xf32, #tpu.memory_space<vmem>>, vector<32x64xf32>
    %cst_12 = arith.constant dense<0.000000e+00> : vector<160x64xf32>
    %9 = tpu.matmul %5, %8, %cst_12 {dimension_numbers = #tpu.dot_dimension_numbers<[1], [0], [0], [1], [0, 0, 1, 1], [], []>} : vector<160x32xf32>, vector<32x64xf32>, vector<160x64xf32> -> vector<160x64xf32>
    %10 = arith.addf %7, %9 : vector<160x64xf32>
    %c0_13 = arith.constant 0 : index
    %c0_14 = arith.constant 0 : index
    %11 = vector.load %arg8[%c0_13, %c0_14] : memref<1x64xf32, #tpu.memory_space<vmem>>, vector<1x64xf32>
    %12 = vector.broadcast %11 : vector<1x64xf32> to vector<160x64xf32>
    %13 = arith.addf %10, %12 : vector<160x64xf32>
    %cst_15 = arith.constant 0.000000e+00 : f32
    %14 = vector.broadcast %cst_15 : f32 to vector<160x64xf32>
    %15 = arith.maximumf %13, %14 : vector<160x64xf32>
    %c0_16 = arith.constant 0 : index
    %c0_17 = arith.constant 0 : index
    %16 = vector.load %arg9[%c0_16, %c0_17] : memref<64x64xf32, #tpu.memory_space<vmem>>, vector<64x64xf32>
    %cst_18 = arith.constant dense<0.000000e+00> : vector<160x64xf32>
    %17 = tpu.matmul %15, %16, %cst_18 {dimension_numbers = #tpu.dot_dimension_numbers<[1], [0], [0], [1], [0, 0, 1, 1], [], []>} : vector<160x64xf32>, vector<64x64xf32>, vector<160x64xf32> -> vector<160x64xf32>
    %c0_19 = arith.constant 0 : index
    %c0_20 = arith.constant 0 : index
    %18 = vector.load %arg10[%c0_19, %c0_20] : memref<1x64xf32, #tpu.memory_space<vmem>>, vector<1x64xf32>
    %19 = vector.broadcast %18 : vector<1x64xf32> to vector<160x64xf32>
    %20 = arith.addf %17, %19 : vector<160x64xf32>
    %cst_21 = arith.constant 0.000000e+00 : f32
    %21 = vector.broadcast %cst_21 : f32 to vector<160x64xf32>
    %22 = arith.maximumf %20, %21 : vector<160x64xf32>
    %c0_22 = arith.constant 0 : index
    %c0_23 = arith.constant 0 : index
    %c0_24 = arith.constant 0 : index
    %23 = vector.load %arg4[%c0_22, %c0_23, %c0_24] : memref<1x160x64xf32, #tpu.memory_space<vmem>>, vector<1x160x64xf32>
    %24 = vector.shape_cast %23 : vector<1x160x64xf32> to vector<160x64xf32>
    %25 = arith.mulf %22, %24 : vector<160x64xf32>
    %26 = vector.extract_strided_slice %25 {offsets = [0, 0], sizes = [160, 32], strides = [1, 1]} : vector<160x64xf32> to vector<160x32xf32>
    %27 = vector.extract_strided_slice %25 {offsets = [0, 32], sizes = [160, 32], strides = [1, 1]} : vector<160x64xf32> to vector<160x32xf32>
    %28 = arith.addf %26, %27 : vector<160x32xf32>
    %c0_25 = arith.constant 0 : index
    %c0_26 = arith.constant 0 : index
    %29 = vector.load %arg5[%c0_25, %c0_26] : memref<40x160xf32, #tpu.memory_space<vmem>>, vector<40x160xf32>
    %cst_27 = arith.constant dense<0.000000e+00> : vector<40x32xf32>
    %30 = tpu.matmul %29, %28, %cst_27 {dimension_numbers = #tpu.dot_dimension_numbers<[1], [0], [0], [1], [0, 0, 1, 1], [], []>} : vector<40x160xf32>, vector<160x32xf32>, vector<40x32xf32> -> vector<40x32xf32>
    %c0_28 = arith.constant 0 : index
    %c0_29 = arith.constant 0 : index
    %31 = vector.load %arg11[%c0_28, %c0_29] : memref<32x32xf32, #tpu.memory_space<vmem>>, vector<32x32xf32>
    %cst_30 = arith.constant dense<0.000000e+00> : vector<40x32xf32>
    %32 = tpu.matmul %1, %31, %cst_30 {dimension_numbers = #tpu.dot_dimension_numbers<[1], [0], [0], [1], [0, 0, 1, 1], [], []>} : vector<40x32xf32>, vector<32x32xf32>, vector<40x32xf32> -> vector<40x32xf32>
    %c0_31 = arith.constant 0 : index
    %c0_32 = arith.constant 0 : index
    %33 = vector.load %arg12[%c0_31, %c0_32] : memref<32x32xf32, #tpu.memory_space<vmem>>, vector<32x32xf32>
    %cst_33 = arith.constant dense<0.000000e+00> : vector<40x32xf32>
    %34 = tpu.matmul %30, %33, %cst_33 {dimension_numbers = #tpu.dot_dimension_numbers<[1], [0], [0], [1], [0, 0, 1, 1], [], []>} : vector<40x32xf32>, vector<32x32xf32>, vector<40x32xf32> -> vector<40x32xf32>
    %35 = arith.addf %32, %34 : vector<40x32xf32>
    %c0_34 = arith.constant 0 : index
    %c0_35 = arith.constant 0 : index
    %36 = vector.load %arg13[%c0_34, %c0_35] : memref<1x32xf32, #tpu.memory_space<vmem>>, vector<1x32xf32>
    %37 = vector.broadcast %36 : vector<1x32xf32> to vector<40x32xf32>
    %38 = arith.addf %35, %37 : vector<40x32xf32>
    %cst_36 = arith.constant 0.000000e+00 : f32
    %39 = vector.broadcast %cst_36 : f32 to vector<40x32xf32>
    %40 = arith.maximumf %38, %39 : vector<40x32xf32>
    %c0_37 = arith.constant 0 : index
    %c0_38 = arith.constant 0 : index
    %41 = vector.load %arg14[%c0_37, %c0_38] : memref<32x32xf32, #tpu.memory_space<vmem>>, vector<32x32xf32>
    %cst_39 = arith.constant dense<0.000000e+00> : vector<40x32xf32>
    %42 = tpu.matmul %40, %41, %cst_39 {dimension_numbers = #tpu.dot_dimension_numbers<[1], [0], [0], [1], [0, 0, 1, 1], [], []>} : vector<40x32xf32>, vector<32x32xf32>, vector<40x32xf32> -> vector<40x32xf32>
    %c0_40 = arith.constant 0 : index
    %c0_41 = arith.constant 0 : index
    %43 = vector.load %arg15[%c0_40, %c0_41] : memref<1x32xf32, #tpu.memory_space<vmem>>, vector<1x32xf32>
    %44 = vector.broadcast %43 : vector<1x32xf32> to vector<40x32xf32>
    %45 = arith.addf %42, %44 : vector<40x32xf32>
    %cst_42 = arith.constant 0.000000e+00 : f32
    %46 = vector.broadcast %cst_42 : f32 to vector<40x32xf32>
    %47 = arith.maximumf %45, %46 : vector<40x32xf32>
    %48 = arith.addf %1, %47 : vector<40x32xf32>
    %c0_43 = arith.constant 0 : index
    %c0_44 = arith.constant 0 : index
    %c0_45 = arith.constant 0 : index
    %49 = vector.load %arg16[%c0_43, %c0_44, %c0_45] : memref<1x40x32xf32, #tpu.memory_space<vmem>>, vector<1x40x32xf32>
    %50 = vector.shape_cast %49 : vector<1x40x32xf32> to vector<40x32xf32>
    %51 = vector.shape_cast %48 : vector<40x32xf32> to vector<1x40x32xf32>
    tpu.vector_store %arg16[%c0_43, %c0_44, %c0_45], %51 {strides = array<i32>} : memref<1x40x32xf32, #tpu.memory_space<vmem>>, vector<1x40x32xf32>,
    return
  }
  func.func @transform_0(%arg0: i32) -> (i32, i32, i32) {
    %c0_i32 = arith.constant 0 : i32
    %c0_i32_0 = arith.constant 0 : i32
    %c0_i32_1 = arith.constant 0 : i32
    return %arg0, %c0_i32, %c0_i32_0 : i32, i32, i32
  }
  func.func @transform_1(%arg0: i32) -> (i32, i32, i32) {
    %c0_i32 = arith.constant 0 : i32
    %c0_i32_0 = arith.constant 0 : i32
    %c0_i32_1 = arith.constant 0 : i32
    return %arg0, %c0_i32, %c0_i32_0 : i32, i32, i32
  }
  func.func @transform_2(%arg0: i32) -> (i32, i32, i32) {
    %c0_i32 = arith.constant 0 : i32
    %c0_i32_0 = arith.constant 0 : i32
    %c0_i32_1 = arith.constant 0 : i32
    return %arg0, %c0_i32, %c0_i32_0 : i32, i32, i32
  }
  func.func @transform_3(%arg0: i32) -> (i32, i32, i32) {
    %c0_i32 = arith.constant 0 : i32
    %c0_i32_0 = arith.constant 0 : i32
    %c0_i32_1 = arith.constant 0 : i32
    return %arg0, %c0_i32, %c0_i32_0 : i32, i32, i32
  }
  func.func @transform_4(%arg0: i32) -> (i32, i32) {
    %c0_i32 = arith.constant 0 : i32
    %c0_i32_0 = arith.constant 0 : i32
    %c0_i32_1 = arith.constant 0 : i32
    return %c0_i32, %c0_i32_0 : i32, i32
  }
  func.func @transform_5(%arg0: i32) -> (i32, i32) {
    %c0_i32 = arith.constant 0 : i32
    %c0_i32_0 = arith.constant 0 : i32
    %c0_i32_1 = arith.constant 0 : i32
    return %c0_i32, %c0_i32_0 : i32, i32
  }
  func.func @transform_6(%arg0: i32) -> (i32, i32) {
    %c0_i32 = arith.constant 0 : i32
    %c0_i32_0 = arith.constant 0 : i32
    %c0_i32_1 = arith.constant 0 : i32
    return %c0_i32, %c0_i32_0 : i32, i32
  }
  func.func @transform_7(%arg0: i32) -> (i32, i32) {
    %c0_i32 = arith.constant 0 : i32
    %c0_i32_0 = arith.constant 0 : i32
    %c0_i32_1 = arith.constant 0 : i32
    return %c0_i32, %c0_i32_0 : i32, i32
  }
  func.func @transform_8(%arg0: i32) -> (i32, i32) {
    %c0_i32 = arith.constant 0 : i32
    %c0_i32_0 = arith.constant 0 : i32
    %c0_i32_1 = arith.constant 0 : i32
    return %c0_i32, %c0_i32_0 : i32, i32
  }
  func.func @transform_9(%arg0: i32) -> (i32, i32) {
    %c0_i32 = arith.constant 0 : i32
    %c0_i32_0 = arith.constant 0 : i32
    %c0_i32_1 = arith.constant 0 : i32
    return %c0_i32, %c0_i32_0 : i32, i32
  }
  func.func @transform_10(%arg0: i32) -> (i32, i32) {
    %c0_i32 = arith.constant 0 : i32
    %c0_i32_0 = arith.constant 0 : i32
    %c0_i32_1 = arith.constant 0 : i32
    return %c0_i32, %c0_i32_0 : i32, i32
  }
  func.func @transform_11(%arg0: i32) -> (i32, i32) {
    %c0_i32 = arith.constant 0 : i32
    %c0_i32_0 = arith.constant 0 : i32
    %c0_i32_1 = arith.constant 0 : i32
    return %c0_i32, %c0_i32_0 : i32, i32
  }
  func.func @transform_12(%arg0: i32) -> (i32, i32) {
    %c0_i32 = arith.constant 0 : i32
    %c0_i32_0 = arith.constant 0 : i32
    %c0_i32_1 = arith.constant 0 : i32
    return %c0_i32, %c0_i32_0 : i32, i32
  }
  func.func @transform_13(%arg0: i32) -> (i32, i32) {
    %c0_i32 = arith.constant 0 : i32
    %c0_i32_0 = arith.constant 0 : i32
    %c0_i32_1 = arith.constant 0 : i32
    return %c0_i32, %c0_i32_0 : i32, i32
  }
  func.func @transform_14(%arg0: i32) -> (i32, i32) {
    %c0_i32 = arith.constant 0 : i32
    %c0_i32_0 = arith.constant 0 : i32
    %c0_i32_1 = arith.constant 0 : i32
    return %c0_i32, %c0_i32_0 : i32, i32
  }
  func.func @transform_15(%arg0: i32) -> (i32, i32, i32) {
    %c0_i32 = arith.constant 0 : i32
    %c0_i32_0 = arith.constant 0 : i32
    %c0_i32_1 = arith.constant 0 : i32
    return %arg0, %c0_i32, %c0_i32_0 : i32, i32, i32
  }
}

</mosaic_0001>

<bundles_post_ra>
// kernel: tpu_custom_call.1
= control target key start
LH: loop header
LB: loop body
LE: loop exit
PB: predicated region body
PF: predicated region fallthrough
CT: control target
= control target key end

     0   :  { %vm103_vm0 = vcmask 261120   ;;  %vm616_vm1 = vcmask 523264   ;;  %s1869_s18 = smov 96   ;;  %vm1870_vm2 = vmmov 0   ;;  %s2616_s6 = inlined_call_operand.vmem [shape: f32[32,64], index: 6, kind: input, shape index: {}]   ;;  %s2617_s5 = inlined_call_operand.vmem [shape: f32[32,64], index: 5, kind: input, shape index: {}]   ;;  %s2618_s2 = inlined_call_operand.vmem [shape: f32[1,160,32], index: 2, kind: input, shape index: {}]   ;;  %s2619_s1 = inlined_call_operand.vmem [shape: f32[1,160,32], index: 1, kind: input, shape index: {}]   ;;  %s2620_s8 = inlined_call_operand.vmem [shape: f32[64,64], index: 8, kind: input, shape index: {}]   ;;  %s2621_s7 = inlined_call_operand.vmem [shape: f32[1,64], index: 7, kind: input, shape index: {}]   ;;  %s2622_s9 = inlined_call_operand.vmem [shape: f32[1,64], index: 9, kind: input, shape index: {}]   ;;  %s2623_s3 = inlined_call_operand.vmem [shape: f32[1,160,64], index: 3, kind: input, shape index: {}]   ;;  %s2624_s4 = inlined_call_operand.vmem [shape: f32[40,160], index: 4, kind: input, shape index: {}]   ;;  %s2625_s10 = inlined_call_operand.vmem [shape: f32[32,32], index: 10, kind: input, shape index: {}]   ;;  %s2626_s11 = inlined_call_operand.vmem [shape: f32[32,32], index: 11, kind: input, shape index: {}]   ;;  %s2627_s0 = inlined_call_operand.vmem [shape: f32[1,40,32], index: 0, kind: input, shape index: {}]   ;;  %s2628_s13 = inlined_call_operand.vmem [shape: f32[32,32], index: 13, kind: input, shape index: {}]   ;;  %s2629_s12 = inlined_call_operand.vmem [shape: f32[1,32], index: 12, kind: input, shape index: {}]   ;;  %s2630_s14 = inlined_call_operand.vmem [shape: f32[1,32], index: 14, kind: input, shape index: {}]   ;;  %s2631_s15 = inlined_call_operand.vmem [shape: f32[1,40,32], index: 15, kind: output, shape index: {}]  }
   0x1   :  { %v102_v0 = vld [vmem:[%s2616_s6 + $0x18] sm:$0xff]  ;;  %v101_v2 = vld [vmem:[%s2616_s6 + $0x10] sm:$0xff]  ;;  %v100_v4 = vld [vmem:[%s2616_s6 + $0x8] sm:$0xff] }
   0x2   :  { %v98_v1 = vld [vmem:[%s2617_s5 + $0x18] sm:$0xff]  ;;  %1674 = vmatprep.subr.mxu0 %v102_v0  ;;  %v97_v3 = vld [vmem:[%s2617_s5 + $0x10] sm:$0xff]  ;;  %v96_v5 = vld [vmem:[%s2617_s5 + $0x8] sm:$0xff] }
   0x3   :  { %1712 = vmatprep.subr.mxu1 %v98_v1  ;;  %1675 = vmatpush3.msra.mxu0 %v102_v0  ;;  %v99_v6 = vld [vmem:[%s2616_s6] sm:$0xff]  ;;  %v76_v10 = vld [vmem:[%s2618_s2 + $0x8] sm:$0xff]  ;;  %v77_v12 = vld [vmem:[%s2618_s2 + $0x10] sm:$0xff] }
   0x4   :  { %1713 = vmatpush3.msra.mxu1 %v98_v1  ;;  %1676 = vmatprep.subr.mxu0 %v101_v2  ;;  %v95_v7 = vld [vmem:[%s2617_s5] sm:$0xff]  ;;  %v56_v11 = vld [vmem:[%s2619_s1 + $0x8] sm:$0xff]  ;;  %v57_v13 = vld [vmem:[%s2619_s1 + $0x10] sm:$0xff] }
   0x5   :  { %1714 = vmatprep.subr.mxu1 %v97_v3  ;;  %1677 = vmatpush3.msra.mxu0 %v101_v2  ;;  %v75_v8 = vld [vmem:[%s2618_s2] sm:$0xff]  ;;  %v78_v14 = vld [vmem:[%s2618_s2 + $0x18] sm:$0xff]  ;;  %v80_v18 = vld [vmem:[%s2618_s2 + $0x28] sm:$0xff] }
   0x6   :  { %1715 = vmatpush3.msra.mxu1 %v97_v3  ;;  %1678 = vmatprep.subr.mxu0 %v100_v4  ;;  %v55_v9 = vld [vmem:[%s2619_s1] sm:$0xff]  ;;  %v58_v15 = vld [vmem:[%s2619_s1 + $0x18] sm:$0xff]  ;;  %v60_v19 = vld [vmem:[%s2619_s1 + $0x28] sm:$0xff] }
   0x7   :  { %1716 = vmatprep.subr.mxu1 %v96_v5  ;;  %1679 = vmatpush3.msra.mxu0 %v100_v4  ;;  %v79_v16 = vld [vmem:[%s2618_s2 + $0x20] sm:$0xff]  ;;  %v81_v20 = vld [vmem:[%s2618_s2 + $0x30] sm:$0xff]  ;;  %v608_v22 = vld [vmem:[%s2620_s8 + $0x38] sm:$0xff] }
   0x8   :  { %1717 = vmatpush3.msra.mxu1 %v96_v5  ;;  %1680 = vmatprep.subr.mxu0 %v99_v6  ;;  %v59_v17 = vld [vmem:[%s2619_s1 + $0x20] sm:$0xff]  ;;  %v61_v21 = vld [vmem:[%s2619_s1 + $0x30] sm:$0xff]  ;;  %v82_v24 = vld [vmem:[%s2618_s2 + $0x38] sm:$0xff] }
   0x9   :  { %1718 = vmatprep.subr.mxu1 %v95_v7  ;;  %1681 = vmatpush3.msra.mxu0 %v99_v6  ;;  %v607_v23 = vld [vmem:[%s2620_s8 + $0x30] sm:$0xff]  ;;  %v62_v25 = vld [vmem:[%s2619_s1 + $0x38] sm:$0xff]  ;;  %v83_v26 = vld [vmem:[%s2618_s2 + $0x40] sm:$0xff] }
   0xa   :  { %1682 = vmatprep.mubr.msk.f32.mxu0 %vm103_vm0, %v75_v8  ;;  %1719 = vmatpush3.msra.mxu1 %v95_v7  ;;  %v63_v27 = vld [vmem:[%s2619_s1 + $0x40] sm:$0xff]  ;;  %v606_v28 = vld [vmem:[%s2620_s8 + $0x28] sm:$0xff]  ;;  %v85_v31 = vld [vmem:[%s2618_s2 + $0x50] sm:$0xff] }
   0xb   :  { %1720 = vmatprep.mubr.msk.f32.mxu1 %vm103_vm0, %v55_v9  ;;  %1683 = vmatmul.mubr.msk.f32.vlgmr.msra.gmra.mxu0 %vm103_vm0, %v76_v10  ;;  %v84_v29 = vld [vmem:[%s2618_s2 + $0x48] sm:$0xff]  ;;  %v65_v32 = vld [vmem:[%s2619_s1 + $0x50] sm:$0xff]  ;;  %v605_v33 = vld [vmem:[%s2620_s8 + $0x20] sm:$0xff] }
   0xc   :  { %1721 = vmatmul.mubr.msk.f32.vlgmr.msra.gmra.mxu1 %vm103_vm0, %v56_v11  ;;  %1685 = vmatprep.mubr.msk.f32.mxu0 %vm103_vm0, %v77_v12  ;;  %v64_v30 = vld [vmem:[%s2619_s1 + $0x48] sm:$0xff]  ;;  %v86_v34 = vld [vmem:[%s2618_s2 + $0x58] sm:$0xff]  ;;  %v87_v36 = vld [vmem:[%s2618_s2 + $0x60] sm:$0xff] }
   0xd   :  { %1723 = vmatprep.mubr.msk.f32.mxu1 %vm103_vm0, %v57_v13  ;;  %1750 = vmatprep.subr.mxu0 %v608_v22  ;;  %v66_v35 = vld [vmem:[%s2619_s1 + $0x58] sm:$0xff]  ;;  %v67_v37 = vld [vmem:[%s2619_s1 + $0x60] sm:$0xff]  ;;  %v88_v39 = vld [vmem:[%s2618_s2 + $0x68] sm:$0xff] }
   0xe   :  { %1751 = vmatpush3.msra.mxu0 %v608_v22  ;;  %v604_v38 = vld [vmem:[%s2620_s8 + $0x18] sm:$0xff]  ;;  %v68_v40 = vld [vmem:[%s2619_s1 + $0x68] sm:$0xff]  ;;  %v89_v41 = vld [vmem:[%s2618_s2 + $0x70] sm:$0xff] }
   0xf   :  { %1686 = vmatmul.mubr.msk.f32.gmra.mxu0 %vm103_vm0, %v78_v14  ;;  %1752 = vmatprep.subr.mxu0 %v607_v23  ;;  %v69_v42 = vld [vmem:[%s2619_s1 + $0x70] sm:$0xff]  ;;  %v90_v44 = vld [vmem:[%s2618_s2 + $0x78] sm:$0xff]  ;;  %v91_v46 = vld [vmem:[%s2618_s2 + $0x80] sm:$0xff] }
  0x10   :  { %1724 = vmatmul.mubr.msk.f32.gmra.mxu1 %vm103_vm0, %v58_v15  ;;  %1688 = vmatprep.mubr.msk.f32.mxu0 %vm103_vm0, %v79_v16  ;;  %v603_v43 = vld [vmem:[%s2620_s8 + $0x10] sm:$0xff]  ;;  %v70_v45 = vld [vmem:[%s2619_s1 + $0x78] sm:$0xff]  ;;  %v71_v47 = vld [vmem:[%s2619_s1 + $0x80] sm:$0xff] }
  0x11   :  { %1726 = vmatprep.mubr.msk.f32.mxu1 %vm103_vm0, %v59_v17  ;;  %1753 = vmatpush3.msra.mxu0 %v607_v23  ;;  %v92_v48 = vld [vmem:[%s2618_s2 + $0x88] sm:$0xff]  ;;  %v93_v50 = vld [vmem:[%s2618_s2 + $0x90] sm:$0xff]  ;;  %v94_v52 = vld [vmem:[%s2618_s2 + $0x98] sm:$0xff] }
  0x12   :  { %1754 = vmatprep.subr.mxu0 %v606_v28  ;;  %v72_v49 = vld [vmem:[%s2619_s1 + $0x88] sm:$0xff]  ;;  %v73_v51 = vld [vmem:[%s2619_s1 + $0x90] sm:$0xff]  ;;  %v74_v53 = vld [vmem:[%s2619_s1 + $0x98] sm:$0xff] }
  0x13   :  { %1689 = vmatmul.mubr.msk.f32.gmra.mxu0 %vm103_vm0, %v80_v18  ;;  %v602_v54 = vld [vmem:[%s2620_s8 + $0x8] sm:$0xff]  ;;  %v601_v55 = vld [vmem:[%s2620_s8] sm:$0xff] }
  0x14   :  { %1727 = vmatmul.mubr.msk.f32.gmra.mxu1 %vm103_vm0, %v60_v19  ;;  %1691 = vmatprep.mubr.msk.f32.mxu0 %vm103_vm0, %v81_v20  ;;  %v2162_v59 = vld [vmem:[%s2621_s7] ss:$0 sm:$0xff] }
  0x15   :  { %1729 = vmatprep.mubr.msk.f32.mxu1 %vm103_vm0, %v61_v21  ;;  %1755 = vmatpush3.msra.mxu0 %v606_v28 }
  0x16   :  { %1756 = vmatprep.subr.mxu0 %v605_v33 }
  0x17   :  { %1692 = vmatmul.mubr.msk.f32.gmra.mxu0 %vm103_vm0, %v82_v24 }
  0x18   :  { %1730 = vmatmul.mubr.msk.f32.gmra.mxu1 %vm103_vm0, %v62_v25  ;;  %1694 = vmatprep.mubr.msk.f32.mxu0 %vm103_vm0, %v83_v26 }
  0x19   :  { %1732 = vmatprep.mubr.msk.f32.mxu1 %vm103_vm0, %v63_v27  ;;  %1757 = vmatpush3.msra.mxu0 %v605_v33 }
  0x1a   :  { %1758 = vmatprep.subr.mxu0 %v604_v38 }
  0x1b   :  { %1695 = vmatmul.mubr.msk.f32.gmra.mxu0 %vm103_vm0, %v84_v29 }
  0x1c   :  { %1733 = vmatmul.mubr.msk.f32.gmra.mxu1 %vm103_vm0, %v64_v30  ;;  %1697 = vmatprep.mubr.msk.f32.mxu0 %vm103_vm0, %v85_v31 }
  0x1d   :  { %1735 = vmatprep.mubr.msk.f32.mxu1 %vm103_vm0, %v65_v32  ;;  %1759 = vmatpush3.msra.mxu0 %v604_v38 }
  0x1e   :  { %1760 = vmatprep.subr.mxu0 %v603_v43 }
  0x1f   :  { %1698 = vmatmul.mubr.msk.f32.gmra.mxu0 %vm103_vm0, %v86_v34 }
  0x20   :  { %1736 = vmatmul.mubr.msk.f32.gmra.mxu1 %vm103_vm0, %v66_v35  ;;  %1700 = vmatprep.mubr.msk.f32.mxu0 %vm103_vm0, %v87_v36 }
  0x21   :  { %1738 = vmatprep.mubr.msk.f32.mxu1 %vm103_vm0, %v67_v37  ;;  %1761 = vmatpush3.msra.mxu0 %v603_v43 }
  0x22   :  { %1762 = vmatprep.subr.mxu0 %v602_v54 }
  0x23   :  { %1701 = vmatmul.mubr.msk.f32.gmra.mxu0 %vm103_vm0, %v88_v39 }
  0x24   :  { %1739 = vmatmul.mubr.msk.f32.gmra.mxu1 %vm103_vm0, %v68_v40  ;;  %1703 = vmatprep.mubr.msk.f32.mxu0 %vm103_vm0, %v89_v41 }
  0x25   :  { %1741 = vmatprep.mubr.msk.f32.mxu1 %vm103_vm0, %v69_v42  ;;  %1763 = vmatpush3.msra.mxu0 %v602_v54 }
  0x26   :  { %1764 = vmatprep.subr.mxu0 %v601_v55 }
  0x27   :  { %1704 = vmatmul.mubr.msk.f32.gmra.mxu0 %vm103_vm0, %v90_v44 }
  0x28   :  { %1742 = vmatmul.mubr.msk.f32.gmra.mxu1 %vm103_vm0, %v70_v45  ;;  %1706 = vmatprep.mubr.msk.f32.mxu0 %vm103_vm0, %v91_v46 }
  0x29   :  { %1744 = vmatprep.mubr.msk.f32.mxu1 %vm103_vm0, %v71_v47  ;;  %1765 = vmatpush3.msra.mxu0 %v601_v55 }
  0x2b   :  { %1707 = vmatmul.mubr.msk.f32.gmra.mxu0 %vm103_vm0, %v92_v48 }
  0x2c   :  { %1745 = vmatmul.mubr.msk.f32.gmra.mxu1 %vm103_vm0, %v72_v49  ;;  %1709 = vmatprep.mubr.msk.f32.mxu0 %vm103_vm0, %v93_v50 }
  0x2d   :  { %1747 = vmatprep.mubr.msk.f32.mxu1 %vm103_vm0, %v73_v51 }
  0x2f   :  { %1710 = vmatmul.mubr.msk.f32.gmra.mxu0 %vm103_vm0, %v94_v52 }
  0x30   :  { %1748 = vmatmul.mubr.msk.f32.gmra.mxu1 %vm103_vm0, %v74_v53 }
  0xcb   :  { %v1684_v56 = vpop.f32.mrf.mxu0 }
  0xcc   :  { %v1722_v57 = vpop.f32.mrf.mxu1 }
  0xcd   :  { %v461_v58 = vadd.f32 %v1722_v57, %v1684_v56  ;;  %v230_v60 = vpop.f32.mrf.mxu0 }
  0xce   :  { %v455_v61 = vpop.f32.mrf.mxu1 }
  0xcf   :  { %v456_v62 = vadd.f32 %v455_v61, %v230_v60  ;;  %v562_v63 = vadd.f32 %v2162_v59, %v461_v58  ;;  %v1687_v0 = vpop.f32.mrf.mxu0 }
  0xd0   :  { %v1725_v1 = vpop.f32.mrf.mxu1 }
  0xd1   :  { %v561_v2 = vadd.f32 %v2162_v59, %v456_v62  ;;  %v471_v3 = vadd.f32 %v1725_v1, %v1687_v0  ;;  %v240_v4 = vpop.f32.mrf.mxu0  ;;  %v582_v8 = vmax.f32 %v562_v63, 0.0 }
  0xd2   :  { %v465_v5 = vpop.f32.mrf.mxu1 }
  0xd3   :  { %v581_v6 = vmax.f32 %v561_v2, 0.0  ;;  %v466_v7 = vadd.f32 %v465_v5, %v240_v4  ;;  %v564_v9 = vadd.f32 %v2162_v59, %v471_v3  ;;  %v1690_v10 = vpop.f32.mrf.mxu0 }
  0xd4   :  { %v1728_v11 = vpop.f32.mrf.mxu1 }
  0xd5   :  { %v563_v12 = vadd.f32 %v2162_v59, %v466_v7  ;;  %v481_v13 = vadd.f32 %v1728_v11, %v1690_v10  ;;  %1766 = vmatprep.mubr.msk.f32.mxu0 %vm616_vm1, %v581_v6  ;;  %v250_v14 = vpop.f32.mrf.mxu0  ;;  %v584_v18 = vmax.f32 %v564_v9, 0.0 }
  0xd6   :  { %v475_v15 = vpop.f32.mrf.mxu1  ;;  %1767 = vmatmul.mubr.msk.f32.vlgmr.msra.gmra.mxu0 %vm616_vm1, %v582_v8 }
  0xd7   :  { %v583_v16 = vmax.f32 %v563_v12, 0.0  ;;  %v476_v17 = vadd.f32 %v475_v15, %v250_v14  ;;  %v566_v19 = vadd.f32 %v2162_v59, %v481_v13  ;;  %v1693_v20 = vpop.f32.mrf.mxu0 }
  0xd8   :  { %v1731_v21 = vpop.f32.mrf.mxu1 }
  0xd9   :  { %v565_v22 = vadd.f32 %v2162_v59, %v476_v17  ;;  %v491_v23 = vadd.f32 %v1731_v21, %v1693_v20  ;;  %1769 = vmatprep.mubr.msk.f32.mxu0 %vm616_vm1, %v583_v16  ;;  %v260_v24 = vpop.f32.mrf.mxu0  ;;  %v586_v28 = vmax.f32 %v566_v19, 0.0 }
  0xda   :  { %v485_v25 = vpop.f32.mrf.mxu1  ;;  %1770 = vmatmul.mubr.msk.f32.gmra.mxu0 %vm616_vm1, %v584_v18 }
  0xdb   :  { %v585_v26 = vmax.f32 %v565_v22, 0.0  ;;  %v486_v27 = vadd.f32 %v485_v25, %v260_v24  ;;  %v568_v29 = vadd.f32 %v2162_v59, %v491_v23  ;;  %v1696_v30 = vpop.f32.mrf.mxu0 }
  0xdc   :  { %v1734_v31 = vpop.f32.mrf.mxu1 }
  0xdd   :  { %v567_v32 = vadd.f32 %v2162_v59, %v486_v27  ;;  %v501_v33 = vadd.f32 %v1734_v31, %v1696_v30  ;;  %1772 = vmatprep.mubr.msk.f32.mxu0 %vm616_vm1, %v585_v26  ;;  %v270_v34 = vpop.f32.mrf.mxu0  ;;  %v588_v38 = vmax.f32 %v568_v29, 0.0 }
  0xde   :  { %v495_v35 = vpop.f32.mrf.mxu1  ;;  %1773 = vmatmul.mubr.msk.f32.gmra.mxu0 %vm616_vm1, %v586_v28 }
  0xdf   :  { %v587_v36 = vmax.f32 %v567_v32, 0.0  ;;  %v496_v37 = vadd.f32 %v495_v35, %v270_v34  ;;  %v570_v39 = vadd.f32 %v2162_v59, %v501_v33  ;;  %v1699_v40 = vpop.f32.mrf.mxu0 }
  0xe0   :  { %v1737_v41 = vpop.f32.mrf.mxu1 }
  0xe1   :  { %v569_v42 = vadd.f32 %v2162_v59, %v496_v37  ;;  %v511_v43 = vadd.f32 %v1737_v41, %v1699_v40  ;;  %1775 = vmatprep.mubr.msk.f32.mxu0 %vm616_vm1, %v587_v36  ;;  %v280_v44 = vpop.f32.mrf.mxu0  ;;  %v590_v48 = vmax.f32 %v570_v39, 0.0  ;;  %v1868_v41 = vmov 0.0  }
  0xe2   :  { %v505_v45 = vpop.f32.mrf.mxu1  ;;  %1776 = vmatmul.mubr.msk.f32.gmra.mxu0 %vm616_vm1, %v588_v38  ;;  %1027 = vmatprep.subr.mxu1 %v1868_v41 }
  0xe3   :  { %v589_v46 = vmax.f32 %v569_v42, 0.0  ;;  %v506_v47 = vadd.f32 %v505_v45, %v280_v44  ;;  %v572_v49 = vadd.f32 %v2162_v59, %v511_v43  ;;  %v1702_v50 = vpop.f32.mrf.mxu0  ;;  %1819 = vmatprep.subr.mxu0 %v1868_v41  ;;  %v2219_v42 = vld [vmem:[%s2622_s9] ss:$0 sm:$0xff] }
  0xe4   :  { %v1740_v51 = vpop.f32.mrf.mxu1 }
  0xe5   :  { %v571_v52 = vadd.f32 %v2162_v59, %v506_v47  ;;  %v521_v53 = vadd.f32 %v1740_v51, %v1702_v50  ;;  %1778 = vmatprep.mubr.msk.f32.mxu0 %vm616_vm1, %v589_v46  ;;  %v290_v54 = vpop.f32.mrf.mxu0  ;;  %v592_v58 = vmax.f32 %v572_v49, 0.0  ;;  %v875_v46 = vld [vmem:[%s2623_s3 + $0x68] sm:$0xff] }
  0xe6   :  { %v515_v55 = vpop.f32.mrf.mxu1  ;;  %1779 = vmatmul.mubr.msk.f32.gmra.mxu0 %vm616_vm1, %v590_v48 }
  0xe7   :  { %v591_v56 = vmax.f32 %v571_v52, 0.0  ;;  %v516_v57 = vadd.f32 %v515_v55, %v290_v54  ;;  %v574_v60 = vadd.f32 %v2162_v59, %v521_v53  ;;  %v1705_v61 = vpop.f32.mrf.mxu0  ;;  %v874_v54 = vld [vmem:[%s2623_s3 + $0x60] sm:$0xff] }
  0xe8   :  { %v1743_v62 = vpop.f32.mrf.mxu1 }
  0xe9   :  { %v573_v63 = vadd.f32 %v2162_v59, %v516_v57  ;;  %v531_v0 = vadd.f32 %v1743_v62, %v1705_v61  ;;  %1781 = vmatprep.mubr.msk.f32.mxu0 %vm616_vm1, %v591_v56  ;;  %v300_v1 = vpop.f32.mrf.mxu0  ;;  %v594_v5 = vmax.f32 %v574_v60, 0.0  ;;  %v877_v56 = vld [vmem:[%s2623_s3 + $0x78] sm:$0xff] }
  0xea   :  { %v525_v2 = vpop.f32.mrf.mxu1  ;;  %1782 = vmatmul.mubr.msk.f32.gmra.mxu0 %vm616_vm1, %v592_v58 }
  0xeb   :  { %v593_v3 = vmax.f32 %v573_v63, 0.0  ;;  %v526_v4 = vadd.f32 %v525_v2, %v300_v1  ;;  %v576_v6 = vadd.f32 %v2162_v59, %v531_v0  ;;  %v1708_v7 = vpop.f32.mrf.mxu0  ;;  %v872_v2 = vld [vmem:[%s2623_s3 + $0x50] sm:$0xff] }
  0xec   :  { %v1746_v8 = vpop.f32.mrf.mxu1 }
  0xed   :  { %v575_v9 = vadd.f32 %v2162_v59, %v526_v4  ;;  %1784 = vmatprep.mubr.msk.f32.mxu0 %vm616_vm1, %v593_v3  ;;  %v541_v10 = vadd.f32 %v1746_v8, %v1708_v7  ;;  %v310_v11 = vpop.f32.mrf.mxu0  ;;  %v596_v16 = vmax.f32 %v576_v6, 0.0  ;;  %v876_v3 = vld [vmem:[%s2623_s3 + $0x70] sm:$0xff] }
  0xee   :  { %1785 = vmatmul.mubr.msk.f32.gmra.mxu0 %vm616_vm1, %v594_v5  ;;  %v535_v12 = vpop.f32.mrf.mxu1 }
  0xef   :  { %v595_v13 = vmax.f32 %v575_v9, 0.0  ;;  %v578_v14 = vadd.f32 %v2162_v59, %v541_v10  ;;  %v536_v15 = vadd.f32 %v535_v12, %v310_v11  ;;  %v1711_v17 = vpop.f32.mrf.mxu0  ;;  %v870_v11 = vld [vmem:[%s2623_s3 + $0x40] sm:$0xff]  ;;  %v873_v12 = vld [vmem:[%s2623_s3 + $0x58] sm:$0xff] }
  0xf0   :  { %v1749_v18 = vpop.f32.mrf.mxu1 }
  0xf1   :  { %1787 = vmatprep.mubr.msk.f32.mxu0 %vm616_vm1, %v595_v13  ;;  %v577_v19 = vadd.f32 %v2162_v59, %v536_v15  ;;  %v551_v20 = vadd.f32 %v1749_v18, %v1711_v17  ;;  %v598_v21 = vmax.f32 %v578_v14, 0.0  ;;  %v320_v22 = vpop.f32.mrf.mxu0 }
  0xf2   :  { %1788 = vmatmul.mubr.msk.f32.gmra.mxu0 %vm616_vm1, %v596_v16  ;;  %v545_v23 = vpop.f32.mrf.mxu1 }
  0xf3   :  { %v597_v24 = vmax.f32 %v577_v19, 0.0  ;;  %v580_v25 = vadd.f32 %v2162_v59, %v551_v20  ;;  %v546_v26 = vadd.f32 %v545_v23, %v320_v22  ;;  %v868_v20 = vld [vmem:[%s2623_s3 + $0x30] sm:$0xff] }
  0xf5   :  { %v579_v27 = vadd.f32 %v2162_v59, %v546_v26  ;;  %1790 = vmatprep.mubr.msk.f32.mxu0 %vm616_vm1, %v597_v24  ;;  %v600_v28 = vmax.f32 %v580_v25, 0.0 }
  0xf6   :  { %1791 = vmatmul.mubr.msk.f32.gmra.mxu0 %vm616_vm1, %v598_v21  ;;  %v871_v21 = vld [vmem:[%s2623_s3 + $0x48] sm:$0xff] }
  0xf7   :  { %v599_v29 = vmax.f32 %v579_v27, 0.0 }
  0xf9   :  { %1793 = vmatprep.mubr.msk.f32.mxu0 %vm616_vm1, %v599_v29  ;;  %v866_v29 = vld [vmem:[%s2623_s3 + $0x20] sm:$0xff] }
  0xfa   :  { %1794 = vmatmul.mubr.msk.f32.gmra.mxu0 %vm616_vm1, %v600_v28 }
  0xfb   :  { %1827 = vmatprep.mubr.msk.f32.mxu0 %vm1870_vm2, %v1868_v41 }
 0x196   :  { %v2204_v30 = vpop.f32.mrf.mxu0 }
 0x198   :  { %v2206_v31 = vpop.f32.mrf.mxu0 }
 0x19a   :  { %v2208_v32 = vpop.f32.mrf.mxu0 }
 0x19c   :  { %v2210_v33 = vpop.f32.mrf.mxu0 }
 0x19d   :  { %v754_v22 = vadd.f32 %v2219_v42, %v2210_v33  ;;  %v744_v33 = vadd.f32 %v2219_v42, %v2206_v31 }
 0x19e   :  { %v2212_v34 = vpop.f32.mrf.mxu0 }
 0x19f   :  { %v769_v23 = vadd.f32 %v2212_v34, %v2219_v42  ;;  %v759_v34 = vadd.f32 %v2208_v32, %v2219_v42  ;;  %v749_v32 = vadd.f32 %v2204_v30, %v2219_v42 }
 0x1a0   :  { %v763_v59 = vpop.f32.mrf.mxu0 }
 0x1a1   :  { %v764_v13 = vadd.f32 %v2219_v42, %v763_v59  ;;  %v869_v59 = vld [vmem:[%s2623_s3 + $0x38] sm:$0xff] }
 0x1a2   :  { %v1777_v35 = vpop.f32.mrf.mxu0 }
 0x1a3   :  { %v779_v14 = vadd.f32 %v1777_v35, %v2219_v42  ;;  %v846_v25 = vmax.f32 %v764_v13, 0.0  ;;  %v1118_v13 = vld [vmem:[%s2625_s10 + $0x8] sm:$0xff] }
 0x1a4   :  { %v773_v36 = vpop.f32.mrf.mxu0 }
 0x1a5   :  { %v774_v4 = vadd.f32 %v2219_v42, %v773_v36  ;;  %v849_v26 = vmax.f32 %v779_v14, 0.0  ;;  %v844_v36 = vmax.f32 %v754_v22, 0.0  ;;  %v1117_v14 = vld [vmem:[%s2625_s10] sm:$0xff] }
 0x1a6   :  { %v1780_v37 = vpop.f32.mrf.mxu0 }
 0x1a7   :  { %v789_v5 = vadd.f32 %v1780_v37, %v2219_v42  ;;  %v848_v16 = vmax.f32 %v774_v4, 0.0  ;;  %v847_v37 = vmax.f32 %v769_v23, 0.0 }
 0x1a8   :  { %v783_v38 = vpop.f32.mrf.mxu0 }
 0x1a9   :  { %v784_v60 = vadd.f32 %v2219_v42, %v783_v38  ;;  %v851_v17 = vmax.f32 %v789_v5, 0.0  ;;  %v2293_v27 = vmul.f32 %v868_v20, %v848_v16  ;;  %v2311_v38 = vmul.f32 %v866_v29, %v846_v25  ;;  %v1003_v5 = vld [vmem:[%s2624_s4 + $0x8] sm:$0xff] }
 0x1aa   :  { %v1783_v39 = vpop.f32.mrf.mxu0  ;;  %1549 = vmatprep.mubr.msk.f32.mxu1 %vm103_vm0, %v1003_v5  ;;  %v2511_v5 = vld [vmem:[%s2627_s0 + $0x8] sm:$0xff] }
 0x1ab   :  { %v799_v61 = vadd.f32 %v1783_v39, %v2219_v42  ;;  %v850_v7 = vmax.f32 %v784_v60, 0.0  ;;  %v2295_v28 = vmul.f32 %v871_v21, %v851_v17  ;;  %v2313_v39 = vmul.f32 %v869_v59, %v849_v26 }
 0x1ac   :  { %v793_v40 = vpop.f32.mrf.mxu0 }
 0x1ad   :  { %v794_v50 = vadd.f32 %v2219_v42, %v793_v40  ;;  %v853_v8 = vmax.f32 %v799_v61, 0.0  ;;  %v2275_v18 = vmul.f32 %v870_v11, %v850_v7  ;;  %v864_v40 = vld [vmem:[%s2623_s3 + $0x10] sm:$0xff]  ;;  %v881_v61 = vld [vmem:[%s2623_s3 + $0x98] sm:$0xff]  ;;  %v879_v7 = vld [vmem:[%s2623_s3 + $0x88] sm:$0xff] }
 0x1ae   :  { %v1786_v43 = vpop.f32.mrf.mxu0  ;;  %v1120_v11 = vld [vmem:[%s2625_s10 + $0x18] sm:$0xff] }
 0x1af   :  { %v809_v44 = vadd.f32 %v1786_v43, %v2219_v42  ;;  %v852_v62 = vmax.f32 %v794_v50, 0.0  ;;  %v2277_v19 = vmul.f32 %v873_v12, %v853_v8  ;;  %v867_v43 = vld [vmem:[%s2623_s3 + $0x28] sm:$0xff]  ;;  %v1119_v12 = vld [vmem:[%s2625_s10 + $0x10] sm:$0xff]  ;;  %1820 = vmatpush3.msra.mxu0 %v1120_v11 }
 0x1b0   :  { %v803_v45 = vpop.f32.mrf.mxu0  ;;  %1821 = vmatprep.subr.mxu0 %v1868_v41 }
 0x1b1   :  { %v855_v47 = vmax.f32 %v809_v44, 0.0  ;;  %v804_v48 = vadd.f32 %v2219_v42, %v803_v45  ;;  %v2259_v9 = vmul.f32 %v872_v2, %v852_v62  ;;  %v842_v44 = vmax.f32 %v744_v33, 0.0  ;;  %1822 = vmatpush3.msra.mxu0 %v1119_v12  ;;  %v1354_v12 = vld [vmem:[%s2628_s13 + $0x10] sm:$0xff] }
 0x1b2   :  { %v1789_v49 = vpop.f32.mrf.mxu0  ;;  %v845_v45 = vmax.f32 %v759_v34, 0.0  ;;  %1823 = vmatprep.subr.mxu0 %v1868_v41 }
 0x1b3   :  { %v854_v51 = vmax.f32 %v804_v48, 0.0  ;;  %v819_v52 = vadd.f32 %v1789_v49, %v2219_v42  ;;  %v2228_v53 = vmul.f32 %v875_v46, %v855_v47  ;;  %v2328_v46 = vmul.f32 %v864_v40, %v844_v36  ;;  %v862_v48 = vld [vmem:[%s2623_s3] sm:$0xff]  ;;  %v865_v49 = vld [vmem:[%s2623_s3 + $0x18] sm:$0xff]  ;;  %1824 = vmatpush3.msra.mxu0 %v1118_v13 }
 0x1b4   :  { %v813_v55 = vpop.f32.mrf.mxu0  ;;  %v2330_v47 = vmul.f32 %v867_v43, %v847_v37  ;;  %1825 = vmatprep.subr.mxu0 %v1868_v41 }
 0x1b5   :  { %v857_v57 = vmax.f32 %v819_v52, 0.0  ;;  %v814_v58 = vadd.f32 %v2219_v42, %v813_v55  ;;  %948 = vrot.lane.b32.xlu1 %v2228_v53, %s1869_s18  ;;  %v2241_v63 = vmul.f32 %v874_v54, %v854_v51  ;;  %v880_v51 = vld [vmem:[%s2623_s3 + $0x90] sm:$0xff]  ;;  %v843_v52 = vmax.f32 %v749_v32, 0.0  ;;  %1826 = vmatpush3.msra.mxu0 %v1117_v14  ;;  %v1353_v14 = vld [vmem:[%s2628_s13 + $0x8] sm:$0xff] }
 0x1b6   :  { %v2257_v6 = vpop.f32.mrf.mxu0  ;;  %v2346_v54 = vmul.f32 %v862_v48, %v842_v44  ;;  %v2348_v55 = vmul.f32 %v865_v49, %v845_v45 }
 0x1b7   :  { %v856_v0 = vmax.f32 %v814_v58, 0.0  ;;  %v2243_v1 = vmul.f32 %v877_v56, %v857_v57  ;;  %v863_v57 = vld [vmem:[%s2623_s3 + $0x8] sm:$0xff] }
 0x1b8   :  { %v823_v15 = vpop.f32.mrf.mxu0  ;;  %v2363_v62 = vmul.f32 %v863_v57, %v843_v52  ;;  %v1005_v52 = vld [vmem:[%s2624_s4 + $0x18] sm:$0xff]  ;;  %v1007_v57 = vld [vmem:[%s2624_s4 + $0x28] sm:$0xff] }
 0x1b9   :  { %952 = vrot.lane.b32.xlu0 %v2243_v1, %s1869_s18  ;;  %946 = vrot.lane.b32.xlu1 %v2241_v63, %s1869_s18  ;;  %v2261_v10 = vmul.f32 %v876_v3, %v856_v0  ;;  %v824_v56 = vadd.f32 %v2219_v42, %v823_v15  ;;  %v829_v0 = vadd.f32 %v2257_v6, %v2219_v42  ;;  %v878_v3 = vld [vmem:[%s2623_s3 + $0x80] sm:$0xff] }
 0x1ba   :  { %v1795_v24 = vpop.f32.mrf.mxu0 }
 0x1bb   :  { %v839_v50 = vadd.f32 %v1795_v24, %v2219_v42  ;;  %v858_v2 = vmax.f32 %v824_v56, 0.0  ;;  %v1004_v56 = vld [vmem:[%s2624_s4 + $0x10] sm:$0xff] }
 0x1bc   :  { %v833_v35 = vpop.f32.mrf.mxu0 }
 0x1bd   :  { %950 = vrot.lane.b32.xlu0 %v2261_v10, %s1869_s18  ;;  %942 = vrot.lane.b32.xlu1 %v2259_v9, %s1869_s18  ;;  %v834_v31 = vadd.f32 %v2219_v42, %v833_v35  ;;  %v861_v58 = vmax.f32 %v839_v50, 0.0  ;;  %v859_v42 = vmax.f32 %v829_v0, 0.0  ;;  %v2380_v6 = vmul.f32 %v878_v3, %v858_v2  ;;  %v1008_v0 = vld [vmem:[%s2624_s4 + $0x30] sm:$0xff]  ;;  %v1011_v2 = vld [vmem:[%s2624_s4 + $0x48] sm:$0xff] }
 0x1be   :  { %v1010_v3 = vld [vmem:[%s2624_s4 + $0x40] sm:$0xff] }
 0x1bf   :  { %v860_v30 = vmax.f32 %v834_v31, 0.0  ;;  %v2370_v4 = vmul.f32 %v881_v61, %v861_v58  ;;  %v2389_v8 = vmul.f32 %v879_v7, %v859_v42  ;;  %v1122_v58 = vld [vmem:[%s2626_s11 + $0x8] sm:$0xff]  ;;  %v1006_v61 = vld [vmem:[%s2624_s4 + $0x20] sm:$0xff]  ;;  %v2520_v42 = vld [vmem:[%s2627_s0 + $0x10] sm:$0xff] }
 0x1c0   :  { %v2538_v7 = vld [vmem:[%s2627_s0 + $0x20] sm:$0xff] }
 0x1c1   :  { %944 = vrot.lane.b32.xlu0 %v2277_v19, %s1869_s18  ;;  %938 = vrot.lane.b32.xlu1 %v2275_v18, %s1869_s18  ;;  %v2354_v60 = vmul.f32 %v880_v51, %v860_v30  ;;  %v1002_v51 = vld [vmem:[%s2624_s4] sm:$0xff] }
 0x1c5   :  { %940 = vrot.lane.b32.xlu0 %v2295_v28, %s1869_s18  ;;  %934 = vrot.lane.b32.xlu1 %v2293_v27, %s1869_s18 }
 0x1c9   :  { %936 = vrot.lane.b32.xlu0 %v2313_v39, %s1869_s18  ;;  %930 = vrot.lane.b32.xlu1 %v2311_v38, %s1869_s18 }
 0x1cd   :  { %932 = vrot.lane.b32.xlu0 %v2330_v47, %s1869_s18  ;;  %926 = vrot.lane.b32.xlu1 %v2328_v46, %s1869_s18 }
 0x1d1   :  { %928 = vrot.lane.b32.xlu0 %v2348_v55, %s1869_s18  ;;  %922 = vrot.lane.b32.xlu1 %v2346_v54, %s1869_s18 }
 0x1d5   :  { %924 = vrot.lane.b32.xlu0 %v2363_v62, %s1869_s18  ;;  %958 = vrot.lane.b32.xlu1 %v2354_v60, %s1869_s18 }
 0x1d9   :  { %960 = vrot.lane.b32.xlu0 %v2370_v4, %s1869_s18  ;;  %954 = vrot.lane.b32.xlu1 %v2380_v6, %s1869_s18 }
 0x1dd   :  { %956 = vrot.lane.b32.xlu0 %v2389_v8, %s1869_s18 }
 0x227   :  { %v949_v15 = vpop.permute.xlu1 %948 }
 0x228   :  { %v995_v24 = vadd.f32 %v949_v15, %v2228_v53 }
 0x22b   :  { %v953_v16 = vpop.permute.xlu0 %952  ;;  %v947_v17 = vpop.permute.xlu1 %946 }
 0x22c   :  { %v997_v20 = vadd.f32 %v953_v16, %v2243_v1  ;;  %v994_v29 = vadd.f32 %v947_v17, %v2241_v63 }
 0x22e   :  { %1028 = vmatpush1.msra.mxu1 %v997_v20 }
 0x22f   :  { %v951_v21 = vpop.permute.xlu0 %950  ;;  %v943_v22 = vpop.permute.xlu1 %942  ;;  %1029 = vmatprep.subr.mxu1 %v1868_v41 }
 0x230   :  { %v996_v23 = vadd.f32 %v951_v21, %v2261_v10  ;;  %v992_v10 = vadd.f32 %v943_v22, %v2259_v9 }
 0x232   :  { %1030 = vmatpush1.msra.mxu1 %v996_v23 }
 0x233   :  { %1031 = vmatprep.subr.mxu1 %v1868_v41  ;;  %v945_v25 = vpop.permute.xlu0 %944  ;;  %v939_v26 = vpop.permute.xlu1 %938 }
 0x234   :  { %1032 = vmatpush1.msra.mxu1 %v995_v24  ;;  %v993_v1 = vadd.f32 %v945_v25, %v2277_v19  ;;  %v990_v35 = vadd.f32 %v939_v26, %v2275_v18 }
 0x235   :  { %1033 = vmatprep.subr.mxu1 %v1868_v41 }
 0x236   :  { %1034 = vmatpush1.msra.mxu1 %v994_v29 }
 0x237   :  { %v941_v59 = vpop.permute.xlu0 %940  ;;  %1035 = vmatprep.subr.mxu1 %v1868_v41  ;;  %v935_v33 = vpop.permute.xlu1 %934 }
 0x238   :  { %1036 = vmatpush1.msra.mxu1 %v993_v1  ;;  %v991_v53 = vadd.f32 %v941_v59, %v2295_v28  ;;  %v988_v37 = vadd.f32 %v935_v33, %v2293_v27  ;;  %v1352_v59 = vld [vmem:[%s2628_s13] sm:$0xff] }
 0x239   :  { %1037 = vmatprep.subr.mxu1 %v1868_v41 }
 0x23a   :  { %1038 = vmatpush1.msra.mxu1 %v992_v10 }
 0x23b   :  { %v937_v34 = vpop.permute.xlu0 %936  ;;  %1039 = vmatprep.subr.mxu1 %v1868_v41  ;;  %v931_v63 = vpop.permute.xlu1 %930 }
 0x23c   :  { %1040 = vmatpush1.msra.mxu1 %v991_v53  ;;  %v989_v19 = vadd.f32 %v937_v34, %v2313_v39  ;;  %v986_v18 = vadd.f32 %v931_v63, %v2311_v38 }
 0x23d   :  { %1041 = vmatprep.subr.mxu1 %v1868_v41 }
 0x23e   :  { %1042 = vmatpush1.msra.mxu1 %v990_v35 }
 0x23f   :  { %v933_v36 = vpop.permute.xlu0 %932  ;;  %1043 = vmatprep.subr.mxu1 %v1868_v41  ;;  %v927_v9 = vpop.permute.xlu1 %926 }
 0x240   :  { %1044 = vmatpush1.msra.mxu1 %v989_v19  ;;  %v987_v28 = vadd.f32 %v933_v36, %v2330_v47  ;;  %v984_v27 = vadd.f32 %v927_v9, %v2328_v46  ;;  %v1564_v36 = vld [vmem:[%s2629_s12] ss:$0 sm:$0xff] }
 0x241   :  { %1045 = vmatprep.subr.mxu1 %v1868_v41 }
 0x242   :  { %1046 = vmatpush1.msra.mxu1 %v988_v37 }
 0x243   :  { %v929_v40 = vpop.permute.xlu0 %928  ;;  %1047 = vmatprep.subr.mxu1 %v1868_v41  ;;  %v923_v39 = vpop.permute.xlu1 %922 }
 0x244   :  { %1048 = vmatpush1.msra.mxu1 %v987_v28  ;;  %v985_v43 = vadd.f32 %v929_v40, %v2348_v55  ;;  %v982_v45 = vadd.f32 %v923_v39, %v2346_v54  ;;  %v1124_v54 = vld [vmem:[%s2626_s11 + $0x18] sm:$0xff]  ;;  %v1123_v55 = vld [vmem:[%s2626_s11 + $0x10] sm:$0xff] }
 0x245   :  { %1049 = vmatprep.subr.mxu1 %v1868_v41 }
 0x246   :  { %1050 = vmatpush1.msra.mxu1 %v986_v18 }
 0x247   :  { %v925_v31 = vpop.permute.xlu0 %924  ;;  %1051 = vmatprep.subr.mxu1 %v1868_v41  ;;  %v959_v44 = vpop.permute.xlu1 %958 }
 0x248   :  { %1052 = vmatpush1.msra.mxu1 %v985_v43  ;;  %v983_v32 = vadd.f32 %v925_v31, %v2363_v62  ;;  %v1000_v46 = vadd.f32 %v959_v44, %v2354_v60  ;;  %v1121_v60 = vld [vmem:[%s2626_s11] sm:$0xff]  ;;  %v1009_v62 = vld [vmem:[%s2624_s4 + $0x38] sm:$0xff] }
 0x249   :  { %1053 = vmatprep.subr.mxu1 %v1868_v41 }
 0x24a   :  { %1054 = vmatpush1.msra.mxu1 %v984_v27 }
 0x24b   :  { %v961_v38 = vpop.permute.xlu0 %960  ;;  %1055 = vmatprep.subr.mxu1 %v1868_v41  ;;  %v955_v49 = vpop.permute.xlu1 %954 }
 0x24c   :  { %1056 = vmatpush1.msra.mxu1 %v983_v32  ;;  %v1001_v47 = vadd.f32 %v961_v38, %v2370_v4  ;;  %v998_v30 = vadd.f32 %v955_v49, %v2380_v6  ;;  %v2502_v4 = vld [vmem:[%s2627_s0] sm:$0xff]  ;;  %v2529_v6 = vld [vmem:[%s2627_s0 + $0x18] sm:$0xff] }
 0x24d   :  { %1057 = vmatprep.subr.mxu1 %v1868_v41  ;;  %1828 = vmatmul.mubr.msk.f32.vlgmr.msra.gmra.mxu0 %vm103_vm0, %v2502_v4 }
 0x24e   :  { %1058 = vmatpush1.msra.mxu1 %v982_v45  ;;  %1830 = vmatprep.mubr.msk.f32.mxu0 %vm1870_vm2, %v1868_v41 }
 0x24f   :  { %v957_v48 = vpop.permute.xlu0 %956  ;;  %1083 = vmatprep.subr.mxu1 %v1868_v41 }
 0x250   :  { %1084 = vmatpush2.msra.mxu1 %v1001_v47  ;;  %v999_v50 = vadd.f32 %v957_v48, %v2389_v8  ;;  %v1355_v8 = vld [vmem:[%s2628_s13 + $0x18] sm:$0xff] }
 0x251   :  { %1085 = vmatprep.subr.mxu1 %v1868_v41  ;;  %1831 = vmatmul.mubr.msk.f32.gmra.mxu0 %vm103_vm0, %v2511_v5 }
 0x252   :  { %1086 = vmatpush2.msra.mxu1 %v1000_v46  ;;  %1833 = vmatprep.mubr.msk.f32.mxu0 %vm1870_vm2, %v1868_v41 }
 0x253   :  { %1087 = vmatprep.subr.mxu1 %v1868_v41 }
 0x254   :  { %1088 = vmatpush2.msra.mxu1 %v999_v50 }
 0x255   :  { %1089 = vmatprep.subr.mxu1 %v1868_v41  ;;  %1834 = vmatmul.mubr.msk.f32.gmra.mxu0 %vm103_vm0, %v2520_v42 }
 0x256   :  { %1090 = vmatpush2.msra.mxu1 %v998_v30  ;;  %1836 = vmatprep.mubr.msk.f32.mxu0 %vm1870_vm2, %v1868_v41 }
 0x257   :  { %1092 = vmatmul.mubr.f32.vlgmr.msra.gmra.mxu1 %v1002_v51  ;;  %1796 = vmatprep.subr.mxu1 %v1868_v41 }
 0x258   :  { %1550 = vmatprep.mubr.msk.f32.mxu1 %vm103_vm0, %v1005_v52  ;;  %1797 = vmatpush3.msra.mxu1 %v1124_v54 }
 0x259   :  { %1798 = vmatprep.subr.mxu1 %v1868_v41  ;;  %1837 = vmatmul.mubr.msk.f32.gmra.mxu0 %vm103_vm0, %v2529_v6 }
 0x25a   :  { %1799 = vmatpush3.msra.mxu1 %v1123_v55  ;;  %1839 = vmatprep.mubr.msk.f32.mxu0 %vm1870_vm2, %v1868_v41 }
 0x25b   :  { %1097 = vmatmul.mubr.f32.gmra.mxu1 %v1004_v56  ;;  %1800 = vmatprep.subr.mxu1 %v1868_v41 }
 0x25c   :  { %1551 = vmatprep.mubr.msk.f32.mxu1 %vm103_vm0, %v1007_v57  ;;  %1801 = vmatpush3.msra.mxu1 %v1122_v58  ;;  %v1565_v57 = vld [vmem:[%s2630_s14] ss:$0 sm:$0xff] }
 0x25d   :  { %1802 = vmatprep.subr.mxu1 %v1868_v41  ;;  %1840 = vmatmul.mubr.msk.f32.gmra.mxu0 %vm103_vm0, %v2538_v7 }
 0x25e   :  { %1803 = vmatpush3.msra.mxu1 %v1121_v60 }
 0x25f   :  { %1102 = vmatmul.mubr.f32.gmra.mxu1 %v1006_v61  ;;  %1842 = vmatprep.subr.mxu1 %v1868_v41 }
 0x260   :  { %1552 = vmatprep.mubr.msk.f32.mxu1 %vm103_vm0, %v1009_v62 }
 0x263   :  { %1107 = vmatmul.mubr.f32.gmra.mxu1 %v1008_v0 }
 0x264   :  { %1553 = vmatprep.mubr.msk.f32.mxu1 %vm103_vm0, %v1011_v2 }
 0x267   :  { %1112 = vmatmul.mubr.f32.gmra.mxu1 %v1010_v3 }
 0x268   :  { %1804 = vmatprep.mubr.msk.f32.mxu1 %vm1870_vm2, %v1868_v41 }
 0x30d   :  { %v1311_v25 = vpop.f32.mrf.mxu0 }
 0x30f   :  { %v1829_v26 = vpop.f32.mrf.mxu0 }
 0x311   :  { %v1316_v29 = vpop.f32.mrf.mxu0 }
 0x313   :  { %v1832_v1 = vpop.f32.mrf.mxu0 }
 0x315   :  { %v1321_v33 = vpop.f32.mrf.mxu0 }
 0x317   :  { %v1093_v11 = vpop.f32.mrf.mxu1  ;;  %v1835_v10 = vpop.f32.mrf.mxu0 }
 0x318   :  { %1805 = vmatmul.mubr.msk.f32.vlgmr.msra.gmra.mxu1 %vm103_vm0, %v1093_v11 }
 0x319   :  { %v1095_v13 = vpop.f32.mrf.mxu1  ;;  %1807 = vmatprep.mubr.msk.f32.mxu1 %vm1870_vm2, %v1868_v41  ;;  %1843 = vmatpush3.msra.mxu1 %v1355_v8  ;;  %v1326_v53 = vpop.f32.mrf.mxu0 }
 0x31a   :  { %1844 = vmatprep.subr.mxu1 %v1868_v41 }
 0x31b   :  { %v1098_v15 = vpop.f32.mrf.mxu1  ;;  %1845 = vmatpush3.msra.mxu1 %v1354_v12  ;;  %v1838_v34 = vpop.f32.mrf.mxu0 }
 0x31c   :  { %1808 = vmatmul.mubr.msk.f32.gmra.mxu1 %vm103_vm0, %v1098_v15  ;;  %1846 = vmatprep.subr.mxu1 %v1868_v41 }
 0x31d   :  { %v1100_v16 = vpop.f32.mrf.mxu1  ;;  %1810 = vmatprep.mubr.msk.f32.mxu1 %vm1870_vm2, %v1868_v41  ;;  %1847 = vmatpush3.msra.mxu1 %v1353_v14  ;;  %v1331_v63 = vpop.f32.mrf.mxu0 }
 0x31e   :  { %1848 = vmatprep.subr.mxu1 %v1868_v41 }
 0x31f   :  { %v1103_v17 = vpop.f32.mrf.mxu1  ;;  %1849 = vmatpush3.msra.mxu1 %v1352_v59  ;;  %v1841_v35 = vpop.f32.mrf.mxu0 }
 0x320   :  { %1811 = vmatmul.mubr.msk.f32.gmra.mxu1 %vm103_vm0, %v1103_v17 }
 0x321   :  { %v1105_v20 = vpop.f32.mrf.mxu1  ;;  %1813 = vmatprep.mubr.msk.f32.mxu1 %vm1870_vm2, %v1868_v41 }
 0x323   :  { %v1108_v21 = vpop.f32.mrf.mxu1 }
 0x324   :  { %1814 = vmatmul.mubr.msk.f32.gmra.mxu1 %vm103_vm0, %v1108_v21 }
 0x325   :  { %v1110_v22 = vpop.f32.mrf.mxu1  ;;  %1816 = vmatprep.mubr.msk.f32.mxu1 %vm1870_vm2, %v1868_v41 }
 0x327   :  { %v1113_v23 = vpop.f32.mrf.mxu1 }
 0x328   :  { %1817 = vmatmul.mubr.msk.f32.gmra.mxu1 %vm103_vm0, %v1113_v23 }
 0x329   :  { %v1115_v24 = vpop.f32.mrf.mxu1  ;;  %1850 = vmatprep.mubr.msk.f32.mxu1 %vm1870_vm2, %v1868_v41 }
 0x3d8   :  { %v1206_v19 = vpop.f32.mrf.mxu1 }
 0x3d9   :  { %v1312_v9 = vadd.f32 %v1311_v25, %v1206_v19 }
 0x3da   :  { %v1806_v37 = vpop.f32.mrf.mxu1 }
 0x3db   :  { %v1342_v28 = vadd.f32 %v1564_v36, %v1312_v9 }
 0x3dc   :  { %v1211_v40 = vpop.f32.mrf.mxu1 }
 0x3dd   :  { %v1347_v18 = vmax.f32 %v1342_v28, 0.0  ;;  %v1317_v39 = vadd.f32 %v1316_v29, %v1211_v40 }
 0x3de   :  { %v1809_v43 = vpop.f32.mrf.mxu1 }
 0x3df   :  { %v1343_v31 = vadd.f32 %v1564_v36, %v1317_v39  ;;  %1851 = vmatmul.mubr.msk.f32.vlgmr.msra.gmra.mxu1 %vm103_vm0, %v1347_v18 }
 0x3e0   :  { %v1216_v27 = vpop.f32.mrf.mxu1  ;;  %1853 = vmatprep.mubr.msk.f32.mxu1 %vm1870_vm2, %v1868_v41 }
 0x3e1   :  { %v1348_v32 = vmax.f32 %v1343_v31, 0.0  ;;  %v1322_v44 = vadd.f32 %v1321_v33, %v1216_v27 }
 0x3e2   :  { %v1812_v38 = vpop.f32.mrf.mxu1 }
 0x3e3   :  { %v1344_v45 = vadd.f32 %v1564_v36, %v1322_v44  ;;  %1854 = vmatmul.mubr.msk.f32.gmra.mxu1 %vm103_vm0, %v1348_v32 }
 0x3e4   :  { %v1221_v47 = vpop.f32.mrf.mxu1  ;;  %1856 = vmatprep.mubr.msk.f32.mxu1 %vm1870_vm2, %v1868_v41 }
 0x3e5   :  { %v1349_v48 = vmax.f32 %v1344_v45, 0.0  ;;  %v1327_v46 = vadd.f32 %v1326_v53, %v1221_v47 }
 0x3e6   :  { %v1815_v49 = vpop.f32.mrf.mxu1 }
 0x3e7   :  { %v1345_v50 = vadd.f32 %v1564_v36, %v1327_v46  ;;  %1857 = vmatmul.mubr.msk.f32.gmra.mxu1 %vm103_vm0, %v1349_v48 }
 0x3e8   :  { %v1226_v30 = vpop.f32.mrf.mxu1  ;;  %1859 = vmatprep.mubr.msk.f32.mxu1 %vm1870_vm2, %v1868_v41 }
 0x3e9   :  { %v1350_v51 = vmax.f32 %v1345_v50, 0.0  ;;  %v1332_v52 = vadd.f32 %v1331_v63, %v1226_v30 }
 0x3ea   :  { %v1818_v54 = vpop.f32.mrf.mxu1 }
 0x3eb   :  { %v1346_v55 = vadd.f32 %v1564_v36, %v1332_v52  ;;  %1860 = vmatmul.mubr.msk.f32.gmra.mxu1 %vm103_vm0, %v1350_v51 }
 0x3ec   :  { %1862 = vmatprep.mubr.msk.f32.mxu1 %vm1870_vm2, %v1868_v41 }
 0x3ed   :  { %v1351_v56 = vmax.f32 %v1346_v55, 0.0 }
 0x3ef   :  { %1863 = vmatmul.mubr.msk.f32.gmra.mxu1 %vm103_vm0, %v1351_v56 }
 0x49f   :  { %v1444_v58 = vpop.f32.mrf.mxu1 }
 0x4a0   :  { %v1445_v60 = vadd.f32 %v1565_v57, %v1444_v58 }
 0x4a1   :  { %v1852_v61 = vpop.f32.mrf.mxu1 }
 0x4a2   :  { %v1468_v62 = vmax.f32 %v1445_v60, 0.0 }
 0x4a3   :  { %v1449_v0 = vpop.f32.mrf.mxu1 }
 0x4a4   :  { %v1473_v2 = vadd.f32 %v1468_v62, %v2502_v4  ;;  %v1450_v3 = vadd.f32 %v1565_v57, %v1449_v0 }
 0x4a5   :  { %v1855_v8 = vpop.f32.mrf.mxu1 }
 0x4a6   :  { %1478 = vst.msk [vmem:[%s2631_s15] sm:$0xff] %vm103_vm0, %v1473_v2  ;;  %v1469_v41 = vmax.f32 %v1450_v3, 0.0 }
 0x4a7   :  { %v1454_v11 = vpop.f32.mrf.mxu1 }
 0x4a8   :  { %v1474_v12 = vadd.f32 %v1469_v41, %v2511_v5  ;;  %v1455_v13 = vadd.f32 %v1565_v57, %v1454_v11 }
 0x4a9   :  { %v1858_v14 = vpop.f32.mrf.mxu1 }
 0x4aa   :  { %1479 = vst.msk [vmem:[%s2631_s15 + $0x8] sm:$0xff] %vm103_vm0, %v1474_v12  ;;  %v1470_v15 = vmax.f32 %v1455_v13, 0.0 }
 0x4ab   :  { %v1459_v4 = vpop.f32.mrf.mxu1 }
 0x4ac   :  { %v1475_v16 = vadd.f32 %v1470_v15, %v2520_v42  ;;  %v1460_v17 = vadd.f32 %v1565_v57, %v1459_v4 }
 0x4ad   :  { %v1861_v20 = vpop.f32.mrf.mxu1 }
 0x4ae   :  { %1480 = vst.msk [vmem:[%s2631_s15 + $0x10] sm:$0xff] %vm103_vm0, %v1475_v16  ;;  %v1471_v21 = vmax.f32 %v1460_v17, 0.0 }
 0x4af   :  { %v1464_v5 = vpop.f32.mrf.mxu1 }
 0x4b0   :  { %v1476_v22 = vadd.f32 %v1471_v21, %v2529_v6  ;;  %v1465_v23 = vadd.f32 %v1565_v57, %v1464_v5 }
 0x4b1   :  { %v1864_v24 = vpop.f32.mrf.mxu1 }
 0x4b2   :  { %1481 = vst.msk [vmem:[%s2631_s15 + $0x18] sm:$0xff] %vm103_vm0, %v1476_v22  ;;  %v1472_v25 = vmax.f32 %v1465_v23, 0.0 }
 0x4b4   :  { %v1477_v42 = vadd.f32 %v1472_v25, %v2538_v7 }
 0x4b6   :  { %1482 = vst.msk [vmem:[%s2631_s15 + $0x20] sm:$0xff] %vm103_vm0, %v1477_v42 }

</bundles_post_ra>
